<compile_context>
chip_gen: v7x
topology: tpu7x:2x2x1
jax: 0.10.0
libtpu: 0.0.40
codegen_flags: <defaults>
</compile_context>

<pallas_src>
import functools

import jax
import jax.numpy as jnp
from jax.experimental import pallas as pl
from jax.experimental.pallas import tpu as pltpu

_MiB = 1024 * 1024
_HAS_BUFFERED = hasattr(pl, "Buffered")


def _round_up(x, m):
    return (x + m - 1) // m * m


def _gelu(h, approximate):
    if approximate:
        # tanh-form GELU: transcendental goes to the EUP (its own VLIW slot).
        return jax.nn.gelu(h, approximate=True)
    # Exact erf-based GELU (torch.nn.GELU() default numerics).
    inv_sqrt2 = jnp.float32(0.7071067811865476)
    return 0.5 * h * (1.0 + jax.lax.erf(h * inv_sqrt2))


def _const_spec(block_shape, index_map):
    """BlockSpec with a constant index_map; single-buffered when supported
    (the block is fetched once, a 2nd pipeline buffer is wasted VMEM)."""
    if _HAS_BUFFERED:
        try:
            return pl.BlockSpec(block_shape, index_map,
                                pipeline_mode=pl.Buffered(1))
        except Exception:  # older jax without pipeline_mode support
            pass
    return pl.BlockSpec(block_shape, index_map)


def _vmem_limit_bytes():
    """Chip VMEM capacity minus headroom for Mosaic internal scratch."""
    try:
        cap = int(pltpu.get_tpu_info().vmem_capacity_bytes)
    except Exception:
        cap = 64 * _MiB  # conservative (v7x per-TC size)
    return cap - 8 * _MiB


# ----------------------------------------------------------------------------
# Kernels
# ----------------------------------------------------------------------------
def _mlp_resident_kernel(x_ref, w1_ref, b1_ref, w2_ref, b2_ref, o_ref, *,
                         approx_gelu):
    """Whole MLP for one row tile; W1/W2 are VMEM-resident across the grid."""
    x = x_ref[...].astype(jnp.bfloat16)
    h = jnp.dot(x, w1_ref[...], preferred_element_type=jnp.float32)
    h = h + b1_ref[...]
    h = _gelu(h, approx_gelu)
    out = jnp.dot(h.astype(jnp.bfloat16), w2_ref[...],
                  preferred_element_type=jnp.float32)
    o_ref[...] = (out + b2_ref[...]).astype(o_ref.dtype)


def _mlp_tiled_kernel(x_ref, w1_ref, b1_ref, w2_ref, b2_ref, o_ref,
                      xb_ref, acc_ref, *, approx_gelu):
    """Hidden-dim (k) is the trailing reduction axis; f32 accumulator in VMEM."""
    k = pl.program_id(1)

    @pl.when(k == 0)
    def _():
        acc_ref[...] = jnp.zeros_like(acc_ref)
        # Hoisted x -> bf16 cast: x block is constant across k, cast it once.
        xb_ref[...] = x_ref[...].astype(jnp.bfloat16)

    # fc1 slice: (tm, D) @ (D, th) -> (tm, th), bf16 operands, f32 accum.
    h = jnp.dot(xb_ref[...], w1_ref[...], preferred_element_type=jnp.float32)
    h = h + b1_ref[...]
    h = _gelu(h, approx_gelu)

    # fc2 partial: (tm, th) @ (th, D) accumulated over hidden slices.
    acc_ref[...] += jnp.dot(h.astype(jnp.bfloat16), w2_ref[...],
                            preferred_element_type=jnp.float32)

    @pl.when(k == pl.num_programs(1) - 1)
    def _():
        o_ref[...] = (acc_ref[...] + b2_ref[...]).astype(o_ref.dtype)


# ----------------------------------------------------------------------------
# Tile selection (VMEM-budgeted)
# ----------------------------------------------------------------------------
def _resident_act_bytes(tm, D, H):
    x_io = 2 * tm * D * 4            # x tile, f32, double-buffered
    out_io = 2 * tm * D * 4          # out tile, f32, double-buffered
    interm = tm * H * 6 + tm * D * 8  # h (f32+bf16), x bf16, out f32
    return x_io + out_io + interm


def _pick_row_tile_resident(M, D, H, act_budget):
    for tm in (1024, 768, 512, 384, 256, 128, 64, 32, 16, 8):
        tm = min(tm, _round_up(M, 8))
        if _resident_act_bytes(tm, D, H) <= act_budget:
            return tm
    return None


def _tiled_bytes(tm, th, D, H):
    x_io = 2 * tm * D * 4 + tm * D * 2                 # x tile + bf16 scratch
    w_io = 2 * (D * th * 2) + 2 * (th * D * 2) + 2 * th * 4 + D * 4
    acc = tm * D * 4
    interm = tm * th * 6
    out_io = 2 * tm * D * 4
    return x_io + w_io + acc + interm + out_io


def _pick_tiles_tiled(M, D, H, budget):
    # Per review: shrink th before tm — tm controls how often the weights are
    # re-streamed from HBM; th only sets the slice / intermediate size.
    th_cands = [t for t in (4096, 2048, 1024, 512, 256, 128) if H % t == 0] or [H]
    for tm in (1024, 512, 256, 128, 64, 32, 16, 8):
        tm = min(tm, _round_up(M, 8))
        for th in th_cands:
            if _tiled_bytes(tm, th, D, H) <= budget:
                return tm, th
    return min(8, _round_up(M, 8)), th_cands[-1]


# ----------------------------------------------------------------------------
# Wrapper
# ----------------------------------------------------------------------------
@functools.partial(jax.jit,
                   static_argnames=("row_tile", "hidden_tile", "approx_gelu"))
def encoder_mlp(x, w1, b1, w2, b2, *, row_tile=None, hidden_tile=None,
                approx_gelu=True):
    """ViT MLP forward: gelu(x @ w1 + b1) @ w2 + b2.  x: (..., D) float32."""
    orig_shape = x.shape
    D = orig_shape[-1]
    H = w1.shape[1]
    x2d = x.reshape(-1, D)
    M = x2d.shape[0]

    vmem_limit = _vmem_limit_bytes()
    budget = vmem_limit - 4 * _MiB        # margin below the compiler limit

    # bf16 matmul operands (MXU rate, half the weight DMA); biases stay f32.
    w1_bf = w1.astype(jnp.bfloat16)
    w2_bf = w2.astype(jnp.bfloat16)
    b1_2d = b1.reshape(1, H).astype(jnp.float32)
    b2_2d = b2.reshape(1, D).astype(jnp.float32)

    weight_bytes = 2 * D * H * 2          # bf16 W1 + W2
    bias_bytes = (H + D) * 4
    wbuf = 1 if _HAS_BUFFERED else 2      # resident-weight buffer count

    # Path selection: resident weights unless they blow the VMEM budget or the
    # caller explicitly requests hidden tiling.
    use_resident = hidden_tile is None
    tm = None
    if use_resident:
        act_budget = budget - wbuf * weight_bytes - bias_bytes
        if act_budget > 0:
            tm = (row_tile if row_tile is not None
                  else _pick_row_tile_resident(M, D, H, act_budget))
        use_resident = tm is not None

    if use_resident:
        M_pad = _round_up(M, tm)
        if M_pad != M:
            x2d = jnp.pad(x2d, ((0, M_pad - M), (0, 0)))
        grid = (M_pad // tm,)

        cost = pl.CostEstimate(
            flops=int(4 * M_pad * D * H),
            transcendentals=int(M_pad * H),
            bytes_accessed=int(M_pad * D * 4 * 2 + weight_bytes + bias_bytes),
        )

        out = pl.pallas_call(
            functools.partial(_mlp_resident_kernel, approx_gelu=approx_gelu),
            out_shape=jax.ShapeDtypeStruct((M_pad, D), x.dtype),
            grid_spec=pltpu.PrefetchScalarGridSpec(
                num_scalar_prefetch=0,
                grid=grid,
                in_specs=[
                    pl.BlockSpec((tm, D), lambda i: (i, 0)),   # x rows
                    _const_spec((D, H), lambda i: (0, 0)),     # W1 resident
                    _const_spec((1, H), lambda i: (0, 0)),     # b1 resident
                    _const_spec((H, D), lambda i: (0, 0)),     # W2 resident
                    _const_spec((1, D), lambda i: (0, 0)),     # b2 resident
                ],
                out_specs=pl.BlockSpec((tm, D), lambda i: (i, 0)),
            ),
            compiler_params=pltpu.CompilerParams(
                dimension_semantics=("parallel",),   # shards rows over TCs
                vmem_limit_bytes=vmem_limit,
            ),
            cost_estimate=cost,
        )(x2d, w1_bf, b1_2d, w2_bf, b2_2d)
    else:
        # Fallback: hidden-tiled reduction (weights too big for VMEM budget).
        tm_t, th = _pick_tiles_tiled(M, D, H, budget)
        if row_tile is not None:
            tm_t = row_tile
        if hidden_tile is not None:
            th = hidden_tile
        assert H % th == 0, "hidden tile must divide 4*inputdim"

        M_pad = _round_up(M, tm_t)
        if M_pad != M:
            x2d = jnp.pad(x2d, ((0, M_pad - M), (0, 0)))
        grid = (M_pad // tm_t, H // th)   # reduction (hidden) axis last
        n_row_tiles = M_pad // tm_t

        cost = pl.CostEstimate(
            flops=int(4 * M_pad * D * H),
            transcendentals=int(M_pad * H),
            # Weights really are re-streamed once per row tile in this path.
            bytes_accessed=int(M_pad * D * 4 * 2
                               + n_row_tiles * (weight_bytes + bias_bytes)),
        )

        out = pl.pallas_call(
            functools.partial(_mlp_tiled_kernel, approx_gelu=approx_gelu),
            out_shape=jax.ShapeDtypeStruct((M_pad, D), x.dtype),
            grid_spec=pltpu.PrefetchScalarGridSpec(
                num_scalar_prefetch=0,
                grid=grid,
                in_specs=[
                    pl.BlockSpec((tm_t, D), lambda i, k: (i, 0)),  # x rows
                    pl.BlockSpec((D, th), lambda i, k: (0, k)),    # W1 slice
                    pl.BlockSpec((1, th), lambda i, k: (0, k)),    # b1 slice
                    pl.BlockSpec((th, D), lambda i, k: (k, 0)),    # W2 slice
                    _const_spec((1, D), lambda i, k: (0, 0)),      # b2
                ],
                out_specs=pl.BlockSpec((tm_t, D), lambda i, k: (i, 0)),
                scratch_shapes=[
                    pltpu.VMEM((tm_t, D), jnp.bfloat16),   # hoisted bf16 x
                    pltpu.VMEM((tm_t, D), jnp.float32),    # f32 accumulator
                ],
            ),
            compiler_params=pltpu.CompilerParams(
                dimension_semantics=("parallel", "arbitrary"),
                vmem_limit_bytes=vmem_limit,
            ),
            cost_estimate=cost,
        )(x2d, w1_bf, b1_2d, w2_bf, b2_2d)

    if M_pad != M:
        out = out[:M]
    return out.reshape(orig_shape)


# ----------------------------------------------------------------------------
# Params / reference / smoke test
# ----------------------------------------------------------------------------
def init_params(key, inputdim):
    """nn.Linear-style init; weights stored as (in, out) for x @ W."""
    hidden = 4 * inputdim
    k1, k2, k3, k4 = jax.random.split(key, 4)
    lim1 = 1.0 / jnp.sqrt(inputdim)
    lim2 = 1.0 / jnp.sqrt(hidden)
    w1 = jax.random.uniform(k1, (inputdim, hidden), jnp.float32, -lim1, lim1)
    b1 = jax.random.uniform(k2, (hidden,), jnp.float32, -lim1, lim1)
    w2 = jax.random.uniform(k3, (hidden, inputdim), jnp.float32, -lim2, lim2)
    b2 = jax.random.uniform(k4, (inputdim,), jnp.float32, -lim2, lim2)
    return w1, b1, w2, b2


def _reference(x, w1, b1, w2, b2):
    h = x @ w1 + b1
    h = jax.nn.gelu(h, approximate=False)   # torch.nn.GELU() default (exact erf)
    return h @ w2 + b2


if __name__ == "__main__":
    key = jax.random.PRNGKey(0)
    kx, kp, kx2, kp2 = jax.random.split(key, 4)

    # --- smoke test 1: resident-weight path ---------------------------------
    B, S, D = 2, 8, 32                      # hidden H = 4*D = 128
    x = jax.random.normal(kx, (B, S, D), jnp.float32)
    w1, b1, w2, b2 = init_params(kp, D)

    out = encoder_mlp(x, w1, b1, w2, b2)
    out = jax.block_until_ready(out)
    ref = _reference(x, w1, b1, w2, b2)
    assert out.shape == x.shape
    # bf16 matmul operands + tanh-GELU -> loosened tolerance vs exact-f32 ref.
    assert jnp.allclose(out, ref, atol=1e-1, rtol=1e-1), "resident path mismatch"
    assert float(jnp.mean(jnp.abs(out - ref))) < 5e-2, "resident mean error"

    # --- smoke test 2: hidden-tiled fallback path (forced via hidden_tile) ---
    B2, S2, D2 = 2, 16, 64                  # H = 256 -> two 128-wide slices
    x2 = jax.random.normal(kx2, (B2, S2, D2), jnp.float32)
    p2 = init_params(kp2, D2)
    out2 = encoder_mlp(x2, *p2, hidden_tile=128)
    out2 = jax.block_until_ready(out2)
    ref2 = _reference(x2, *p2)
    assert out2.shape == x2.shape
    assert jnp.allclose(out2, ref2, atol=1e-1, rtol=1e-1), "tiled path mismatch"
    assert float(jnp.mean(jnp.abs(out2 - ref2))) < 5e-2, "tiled mean error"

    print("KERNEL_OK")
</pallas_src>

<mosaic_0001>
module attributes {stable_mosaic.version = 11 : i64} {
  func.func @_mlp_resident_kernel(%arg0: i32, %arg1: memref<16x32xf32, #tpu.memory_space<vmem>>, %arg2: memref<32x128xbf16, #tpu.memory_space<vmem>>, %arg3: memref<1x128xf32, #tpu.memory_space<vmem>>, %arg4: memref<128x32xbf16, #tpu.memory_space<vmem>>, %arg5: memref<1x32xf32, #tpu.memory_space<vmem>>, %arg6: memref<16x32xf32, #tpu.memory_space<vmem>>) attributes {dimension_semantics = [#tpu.dimension_semantics<parallel>], iteration_bounds = array<i64: 1>, scalar_prefetch = 0 : i64, scratch_operands = 0 : i64, tpu.core_type = #tpu.core_type<tc>, window_params = [{transform_indices = @transform_0, window_bounds = array<i64: 16, 32>}, {pipeline_mode = #tpu.pipeline_mode<synchronous>, transform_indices = @transform_1, window_bounds = array<i64: 32, 128>}, {pipeline_mode = #tpu.pipeline_mode<synchronous>, transform_indices = @transform_2, window_bounds = array<i64: 1, 128>}, {pipeline_mode = #tpu.pipeline_mode<synchronous>, transform_indices = @transform_3, window_bounds = array<i64: 128, 32>}, {pipeline_mode = #tpu.pipeline_mode<synchronous>, transform_indices = @transform_4, window_bounds = array<i64: 1, 32>}, {transform_indices = @transform_5, window_bounds = array<i64: 16, 32>}]} {
    %c0 = arith.constant 0 : index
    %c0_0 = arith.constant 0 : index
    %0 = vector.load %arg1[%c0, %c0_0] : memref<16x32xf32, #tpu.memory_space<vmem>>, vector<16x32xf32>
    %1 = arith.truncf %0 : vector<16x32xf32> to vector<16x32xbf16>
    %c0_1 = arith.constant 0 : index
    %c0_2 = arith.constant 0 : index
    %2 = vector.load %arg2[%c0_1, %c0_2] : memref<32x128xbf16, #tpu.memory_space<vmem>>, vector<32x128xbf16>
    %cst = arith.constant dense<0.000000e+00> : vector<16x128xf32>
    %3 = tpu.matmul %1, %2, %cst {dimension_numbers = #tpu.dot_dimension_numbers<[1], [0], [0], [1], [0, 0, 1, 1], [], []>} : vector<16x32xbf16>, vector<32x128xbf16>, vector<16x128xf32> -> vector<16x128xf32>
    %c0_3 = arith.constant 0 : index
    %c0_4 = arith.constant 0 : index
    %4 = vector.load %arg3[%c0_3, %c0_4] : memref<1x128xf32, #tpu.memory_space<vmem>>, vector<1x128xf32>
    %5 = vector.broadcast %4 : vector<1x128xf32> to vector<16x128xf32>
    %6 = arith.addf %3, %5 : vector<16x128xf32>
    %7 = arith.mulf %6, %6 : vector<16x128xf32>
    %8 = arith.mulf %6, %7 : vector<16x128xf32>
    %cst_5 = arith.constant 4.471500e-02 : f32
    %9 = vector.broadcast %cst_5 : f32 to vector<16x128xf32>
    %10 = arith.mulf %9, %8 : vector<16x128xf32>
    %11 = arith.addf %6, %10 : vector<16x128xf32>
    %cst_6 = arith.constant 0.797884583 : f32
    %12 = vector.broadcast %cst_6 : f32 to vector<16x128xf32>
    %13 = arith.mulf %12, %11 : vector<16x128xf32>
    %14 = math.tanh %13 : vector<16x128xf32>
    %cst_7 = arith.constant 1.000000e+00 : f32
    %15 = vector.broadcast %cst_7 : f32 to vector<16x128xf32>
    %16 = arith.addf %15, %14 : vector<16x128xf32>
    %cst_8 = arith.constant 5.000000e-01 : f32
    %17 = vector.broadcast %cst_8 : f32 to vector<16x128xf32>
    %18 = arith.mulf %17, %16 : vector<16x128xf32>
    %19 = arith.mulf %6, %18 : vector<16x128xf32>
    %20 = arith.truncf %19 : vector<16x128xf32> to vector<16x128xbf16>
    %c0_9 = arith.constant 0 : index
    %c0_10 = arith.constant 0 : index
    %21 = vector.load %arg4[%c0_9, %c0_10] : memref<128x32xbf16, #tpu.memory_space<vmem>>, vector<128x32xbf16>
    %cst_11 = arith.constant dense<0.000000e+00> : vector<16x32xf32>
    %22 = tpu.matmul %20, %21, %cst_11 {dimension_numbers = #tpu.dot_dimension_numbers<[1], [0], [0], [1], [0, 0, 1, 1], [], []>} : vector<16x128xbf16>, vector<128x32xbf16>, vector<16x32xf32> -> vector<16x32xf32>
    %c0_12 = arith.constant 0 : index
    %c0_13 = arith.constant 0 : index
    %23 = vector.load %arg5[%c0_12, %c0_13] : memref<1x32xf32, #tpu.memory_space<vmem>>, vector<1x32xf32>
    %24 = vector.broadcast %23 : vector<1x32xf32> to vector<16x32xf32>
    %25 = arith.addf %22, %24 : vector<16x32xf32>
    %c0_14 = arith.constant 0 : index
    %c0_15 = arith.constant 0 : index
    %26 = vector.load %arg6[%c0_14, %c0_15] : memref<16x32xf32, #tpu.memory_space<vmem>>, vector<16x32xf32>
    tpu.vector_store %arg6[%c0_14, %c0_15], %25 {strides = array<i32>} : memref<16x32xf32, #tpu.memory_space<vmem>>, vector<16x32xf32>,
    return
  }
  func.func @transform_0(%arg0: i32) -> (i32, i32) {
    %c0_i32 = arith.constant 0 : i32
    %c0_i32_0 = arith.constant 0 : i32
    return %arg0, %c0_i32 : i32, i32
  }
  func.func @transform_1(%arg0: i32) -> (i32, i32) {
    %c0_i32 = arith.constant 0 : i32
    %c0_i32_0 = arith.constant 0 : i32
    %c0_i32_1 = arith.constant 0 : i32
    return %c0_i32, %c0_i32_0 : i32, i32
  }
  func.func @transform_2(%arg0: i32) -> (i32, i32) {
    %c0_i32 = arith.constant 0 : i32
    %c0_i32_0 = arith.constant 0 : i32
    %c0_i32_1 = arith.constant 0 : i32
    return %c0_i32, %c0_i32_0 : i32, i32
  }
  func.func @transform_3(%arg0: i32) -> (i32, i32) {
    %c0_i32 = arith.constant 0 : i32
    %c0_i32_0 = arith.constant 0 : i32
    %c0_i32_1 = arith.constant 0 : i32
    return %c0_i32, %c0_i32_0 : i32, i32
  }
  func.func @transform_4(%arg0: i32) -> (i32, i32) {
    %c0_i32 = arith.constant 0 : i32
    %c0_i32_0 = arith.constant 0 : i32
    %c0_i32_1 = arith.constant 0 : i32
    return %c0_i32, %c0_i32_0 : i32, i32
  }
  func.func @transform_5(%arg0: i32) -> (i32, i32) {
    %c0_i32 = arith.constant 0 : i32
    %c0_i32_0 = arith.constant 0 : i32
    return %arg0, %c0_i32 : i32, i32
  }
}

</mosaic_0001>

<bundles_post_ra>
// kernel: encoder_mlp.1
= control target key start
LH: loop header
LB: loop body
LE: loop exit
PB: predicated region body
PF: predicated region fallthrough
CT: control target
= control target key end

     0   :  { %v338_v1 = vmov 0.0   ;;  %vm339_vm0 = vmmov 0   ;;  %vm48_vm1 = vcmask 261120   ;;  %s430_s0 = inlined_call_operand.vmem [shape: f32[16,32], index: 0, kind: input, shape index: {}]   ;;  %s431_s1 = inlined_call_operand.vmem [shape: bf16[32,128], index: 1, kind: input, shape index: {}]   ;;  %s432_s2 = inlined_call_operand.vmem [shape: f32[1,128], index: 2, kind: input, shape index: {}]   ;;  %s433_s3 = inlined_call_operand.vmem [shape: bf16[128,32], index: 3, kind: input, shape index: {}]   ;;  %s434_s4 = inlined_call_operand.vmem [shape: f32[1,32], index: 4, kind: input, shape index: {}]   ;;  %s435_s5 = inlined_call_operand.hbm [shape: f32[16,32], index: 5, kind: output, shape index: {}]  }
   0x1   :  { %v300_v0 = vld [vmem:[%s431_s1] sm:$0xff]   ;;  %267 = vmatprep.subr.bf16.mxu0 %v338_v1  ;;  %275 = vmatprep.subr.bf16.mxu1 %v338_v1  ;;  %v301_v2 = vld [vmem:[%s431_s1 + $0x8] sm:$0xff]  }
   0x2   :  { %268 = vmatpush3.bf16.msra.mxu0 %v300_v0  ;;  %271 = vmatprep.mubr.msk.bf16.mxu0 %vm339_vm0, %v338_v1  ;;  %v22_v3 = vld [vmem:[%s430_s0] sm:$0xff]  ;;  %v23_v4 = vld [vmem:[%s430_s0 + $0x8] sm:$0xff] }
   0x3   :  { %269 = vmatprep.subr.bf16.mxu0 %v338_v1  ;;  %291 = vmatprep.mubr.msk.bf16.mxu1 %vm339_vm0, %v338_v1  ;;  %v24_v5 = vpack.c.bf16 %v23_v4, %v22_v3 }
   0x6   :  { %270 = vmatpush3.bf16.msra.mxu0 %v301_v2 }
   0x7   :  { %10 = vsyncpa [#allocation3], 0  ;;  %v302_v6 = vld [vmem:[%s433_s3] sm:$0xff]   ;;  %v303_v7 = vld [vmem:[%s433_s3 + $0x8] sm:$0xff]   ;;  %s340_s17 = smov [#allocation2]  }
   0x8   :  { %276 = vmatpush3.bf16.msra.mxu1 %v302_v6  ;;  %v304_v8 = vld [vmem:[%s433_s3 + $0x10] sm:$0xff]   ;;  %v305_v9 = vld [vmem:[%s433_s3 + $0x18] sm:$0xff]   ;;  %v306_v10 = vld [vmem:[%s433_s3 + $0x20] sm:$0xff]   ;;  %s231_s18 = sshll.u32 %s340_s17, 4  ;;  %s232_s18 = int_to_ptr.vmem [resolvable:$true] %s231_s18 }
   0x9   :  { %272 = vmatmul.mubr.msk.bf16.vlgmr.msra.gmra.mrb[0].mxu0 %vm48_vm1, %v24_v5  ;;  %277 = vmatprep.subr.bf16.mxu1 %v338_v1  ;;  %v307_v11 = vld [vmem:[%s433_s3 + $0x28] sm:$0xff]   ;;  %v308_v12 = vld [vmem:[%s433_s3 + $0x30] sm:$0xff]   ;;  %v309_v13 = vld [vmem:[%s433_s3 + $0x38] sm:$0xff]   ;;  %s314_s19 = scalar_lea.vmem %s232_s18, 256  ;;  %p319_p1 = scmp.lt.s32.totalorder %s232_s18, %s232_s18 }
   0xa   :  { %v242_v14 = vld [vmem:[%s432_s2] ss:$0 sm:$0xff]  ;;  %p315_p0 = scmp.ne.s32.totalorder %s232_s18, %s314_s19  ;;  %p320_p2 = scmp.lt.s32.totalorder %s314_s19, %s314_s19 }
   0xb   :  { %v246_v40 = vld [vmem:[%s434_s4] ss:$0 sm:$0xff] }
   0xc   :  { %278 = vmatpush3.bf16.msra.mxu1 %v303_v7  ;;  %p321_p3 = por %p320_p2, %p319_p1 }
   0xd   :  { %279 = vmatprep.subr.bf16.mxu1 %v338_v1 }
   0xe   :  { %p322_p4 = pnand %p321_p3, %p315_p0 }
  0x10   :  { %280 = vmatpush3.bf16.msra.mxu1 %v304_v8 }
  0x11   :  { %281 = vmatprep.subr.bf16.mxu1 %v338_v1 }
  0x14   :  { %282 = vmatpush3.bf16.msra.mxu1 %v305_v9 }
  0x15   :  { %283 = vmatprep.subr.bf16.mxu1 %v338_v1 }
  0x18   :  { %284 = vmatpush3.bf16.msra.mxu1 %v306_v10 }
  0x19   :  { %285 = vmatprep.subr.bf16.mxu1 %v338_v1 }
  0x1c   :  { %286 = vmatpush3.bf16.msra.mxu1 %v307_v11 }
  0x1d   :  { %287 = vmatprep.subr.bf16.mxu1 %v338_v1 }
  0x20   :  { %288 = vmatpush3.bf16.msra.mxu1 %v308_v12 }
  0x21   :  { %289 = vmatprep.subr.bf16.mxu1 %v338_v1 }
  0x24   :  { %290 = vmatpush3.bf16.msra.mxu1 %v309_v13 }
  0xdc   :  { %v86_v15 = vpop.f32.mrb[0].mxu0 }
  0xdd   :  { %v87_v16 = vadd.f32 %v242_v14, %v86_v15  ;;  %v273_v17 = vpop.f32.mrb[1].mxu0 }
  0xde   :  { %v89_v18 = vpop.f32.mrb[2].mxu0 }
  0xdf   :  { %v93_v19 = vmul.f32 %v87_v16, %v87_v16  ;;  %v90_v20 = vadd.f32 %v242_v14, %v89_v18  ;;  %v274_v21 = vpop.f32.mrb[3].mxu0 }
  0xe1   :  { %v95_v22 = vmul.f32 %v93_v19, %v87_v16  ;;  %v94_v23 = vmul.f32 %v90_v20, %v90_v20 }
  0xe3   :  { %v97_v24 = vmul.f32 0.044715, %v95_v22  ;;  %v96_v25 = vmul.f32 %v94_v23, %v90_v20 }
  0xe5   :  { %v99_v26 = vadd.f32 %v97_v24, %v87_v16  ;;  %v98_v27 = vmul.f32 0.044715, %v96_v25 }
  0xe7   :  { %v101_v28 = vmul.f32 0.7978846, %v99_v26  ;;  %v100_v29 = vadd.f32 %v98_v27, %v90_v20 }
  0xe9   :  { %310 = vtanh.f32 %v101_v28  ;;  %v102_v30 = vmul.f32 0.7978846, %v100_v29 }
  0xeb   :  { %312 = vtanh.f32 %v102_v30 }
  0xf3   :  { %v311_v31 = vpop.eup %310 }
  0xf4   :  { %v105_v32 = vadd.f32 1.0, %v311_v31 }
  0xf5   :  { %v313_v33 = vpop.eup %312 }
  0xf6   :  { %v106_v34 = vadd.f32 1.0, %v313_v33  ;;  %v107_v35 = vmul.f32 0.5, %v105_v32 }
  0xf8   :  { %v108_v36 = vmul.f32 0.5, %v106_v34  ;;  %v109_v37 = vmul.f32 %v107_v35, %v87_v16 }
  0xfa   :  { %v110_v38 = vmul.f32 %v108_v36, %v90_v20 }
  0xfc   :  { %v111_v39 = vpack.c.bf16 %v110_v38, %v109_v37 }
  0xfe   :  { %292 = vmatmul.mubr.bf16.vlgmr.msra.gmra.mrb[0].mxu1 %v111_v39 }
 0x1d1   :  { %v217_v41 = vpop.f32.mrb[0].mxu1 }
 0x1d2   :  { %v218_v42 = vadd.f32 %v246_v40, %v217_v41  ;;  %v293_v43 = vpop.f32.mrb[1].mxu1 }
 0x1d3   :  { %v220_v44 = vpop.f32.mrb[2].mxu1 }
 0x1d4   :  { %224 = vst.msk [vmem:[#allocation2] sm:$0xff] %vm48_vm1, %v218_v42  ;;  %v221_v45 = vadd.f32 %v246_v40, %v220_v44  ;;  %v294_v46 = vpop.f32.mrb[3].mxu1 }
 0x1d6   :  { %225 = vst.msk [vmem:[#allocation2 + $0x8] sm:$0xff] %vm48_vm1, %v221_v45 }
 0x1d7   :  { %325 = shalt.err (!%p322_p4)
}
 0x1d8   :  { %s326_s21 = scalar_lea.hbm %s435_s5, 256 }
 0x1d9   :  { %p327_p5 = scmp.ne.s32.totalorder %s435_s5, %s326_s21  ;;  %p330_p6 = scmp.lt.u32.totalorder %s326_s21, %s435_s5 }
 0x1db   :  { %p332_p7 = pnand %p330_p6, %p327_p5 }
 0x1dd   :  { %335 = shalt.err (!%p332_p7)
}
 0x1de   :  { %s341_s26 = smov 128   ;;  %s342_s1 = smov 8  }
 0x1df   :  { %237 = dma.vmem_to_hbm [thread:$0]  %s232_s18, 256, %s435_s5, [#allocation3], %s341_s26, %s341_s26, %s342_s1  }
 0x1e0   :  { %336 = dma.done.wait [#allocation3], 256  }
 0x1e1   :  { %337 = vsyncadd [#allocation3], 4294967040 }
 0x1e2   :  { %241 = vsyncpa [#allocation3], 1 }

</bundles_post_ra>
